<compile_context>
chip_gen: v7x
topology: tpu7x:2x2x1
jax: 0.10.0
libtpu: 0.0.40
codegen_flags: <defaults>
</compile_context>

<pallas_src>
import math

import jax
import jax.numpy as jnp
from jax import lax
from jax.experimental import pallas as pl
from jax.experimental.pallas import tpu as pltpu


def _round_up(x, m):
    return ((x + m - 1) // m) * m


# ---------------------------------------------------------------------------
# Stage 1: node projection  z = fc(h)  (+ constant-1 denominator column),
#          attention logit  e_src = z . a_src  (lane-major (1, N) row)
# ---------------------------------------------------------------------------
def project_kernel(h_ref, w_ref, asrc_ref, onehot_ref, z_ref, es_ref):
    # bf16 x bf16 -> f32 accumulate on the MXU.
    z = jnp.dot(h_ref[...], w_ref[...], preferred_element_type=jnp.float32)  # (TR, Dp)

    # e_src produced directly lane-major as a (1, TR) row (contraction over D),
    # so the wrapper/stage-2 never relayouts it.
    es_ref[...] = lax.dot_general(
        asrc_ref[...], z, dimension_numbers=(((1,), (1,)), ((), ())),
        preferred_element_type=jnp.float32)                                   # (1, TR)

    # Column `out_dim` of z is exactly 0 (zero-padded fc weight); adding the
    # one-hot row puts an exact 1.0 there -> MXU computes the softmax
    # denominator for free in stage 2.
    z_ref[...] = (z + onehot_ref[...]).astype(jnp.bfloat16)


# ---------------------------------------------------------------------------
# Stage 2: masked aggregation.  out[v] = (adj[v,:] * w) @ z / (adj[v,:] @ w)
# ---------------------------------------------------------------------------
def make_attn_kernel(out_dim, tile_src, resident_z):
    def attn_kernel(adj_ref, sw_ref, z_ref, out_ref):
        j = pl.program_id(1)

        @pl.when(j == 0)
        def _init():
            out_ref[...] = jnp.zeros_like(out_ref)

        # p[v,u] = adj[v,u] * exp(a_src.z_u - shift); exactly 0 on non-edges.
        # adj is 0/1 so the bf16 product carries full bf16 precision of w.
        p = adj_ref[...].astype(jnp.bfloat16) * sw_ref[...].astype(jnp.bfloat16)

        if resident_z:
            start = pl.multiple_of(j * tile_src, tile_src)
            z_blk = z_ref[pl.ds(start, tile_src), :]          # slice resident z
        else:
            z_blk = z_ref[...]

        # Numerator columns [:out_dim] and the denominator column [out_dim]
        # accumulate together on the MXU, directly into the resident out block.
        out_ref[...] += jnp.dot(p, z_blk, preferred_element_type=jnp.float32)

        @pl.when(j == pl.num_programs(1) - 1)
        def _finalize():
            # Guard: a destination with zero incoming edges yields 0, not NaN.
            denom = jnp.maximum(out_ref[:, out_dim:out_dim + 1], 1e-30)
            out_ref[...] = out_ref[...] * pl.reciprocal(denom, approx=True)

    return attn_kernel


def graph_layer(h, w_fc, a_attn, adj_dst, *,
                tile_rows=512, tile_dst=256, tile_src=512):
    """GraphLayer forward.

    h       : (N, in_dim)
    w_fc    : (in_dim, out_dim)   == torch fc.weight.T
    a_attn  : (2*out_dim, 1)      == torch attn_fc.weight.T
    adj_dst : (N, N) dst-major adjacency, adj_dst[v, u] = 1 iff edge u -> v
              (int8 preferred; any numeric dtype accepted).
    returns : (N, out_dim) float32

    Note: the a_dst half of a_attn is mathematically irrelevant to the forward
    output (it is constant within each per-destination softmax), so it is not
    read.  If per-source logits can span more than ~85 nats below the global
    max, exp() would underflow for those edges — keep the online-softmax
    variant for such extreme logit ranges.
    """
    N, in_dim = h.shape
    out_dim = w_fc.shape[1]
    d_pad = _round_up(out_dim + 1, 128)           # +1 reserves the denominator column

    # Clamp tiles for small graphs so padding stays minimal.
    n128 = _round_up(N, 128)
    tile_rows = min(tile_rows, n128)
    tile_src = min(tile_src, n128)
    tile_dst = min(tile_dst, n128)

    # Independent dst / src padding (no lcm blow-up across unequal tiles).
    n_src_pad = _round_up(N, math.lcm(tile_rows, tile_src))
    n_dst_pad = _round_up(N, tile_dst)

    # ---- pad & cast inputs (adjacency stays int8 => 4x less HBM traffic) ----
    h_p = jnp.zeros((n_src_pad, in_dim), jnp.bfloat16).at[:N].set(
        h.astype(jnp.bfloat16))
    w_p = jnp.zeros((in_dim, d_pad), jnp.bfloat16).at[:, :out_dim].set(
        w_fc.astype(jnp.bfloat16))
    a_src = jnp.zeros((1, d_pad), jnp.float32).at[0, :out_dim].set(
        a_attn[:out_dim, 0].astype(jnp.float32))
    onehot = jnp.zeros((1, d_pad), jnp.float32).at[0, out_dim].set(1.0)

    if adj_dst.shape == (n_dst_pad, n_src_pad) and adj_dst.dtype == jnp.int8:
        adj_p = adj_dst                                   # no padded copy needed
    else:
        adj_p = jnp.zeros((n_dst_pad, n_src_pad), jnp.int8).at[:N, :N].set(
            adj_dst.astype(jnp.int8))

    # ---------------- stage 1: z (with ones column) and e_src ----------------
    n_row_tiles = n_src_pad // tile_rows
    z_pad, e_src = pl.pallas_call(
        project_kernel,
        out_shape=(jax.ShapeDtypeStruct((n_src_pad, d_pad), jnp.bfloat16),
                   jax.ShapeDtypeStruct((1, n_src_pad), jnp.float32)),
        grid_spec=pltpu.PrefetchScalarGridSpec(
            num_scalar_prefetch=0,
            grid=(n_row_tiles,),
            in_specs=[pl.BlockSpec((tile_rows, in_dim), lambda i: (i, 0)),
                      pl.BlockSpec((in_dim, d_pad), lambda i: (0, 0)),
                      pl.BlockSpec((1, d_pad), lambda i: (0, 0)),
                      pl.BlockSpec((1, d_pad), lambda i: (0, 0))],
            out_specs=(pl.BlockSpec((tile_rows, d_pad), lambda i: (i, 0)),
                       pl.BlockSpec((1, tile_rows), lambda i: (0, i)))),
        compiler_params=pltpu.CompilerParams(
            dimension_semantics=("parallel",)),
        cost_estimate=pl.CostEstimate(
            flops=int(2 * n_src_pad * in_dim * d_pad + 3 * n_src_pad * d_pad),
            transcendentals=0,
            bytes_accessed=int(n_src_pad * in_dim * 2 + in_dim * d_pad * 2
                               + n_src_pad * d_pad * 2 + n_src_pad * 4)),
    )(h_p, w_p, a_src, onehot)

    # ---- O(N) wrapper work: global shift + per-source softmax weights -------
    shift = jnp.max(e_src[:, :N])                 # upper bound on every logit
    src_w = jnp.exp(e_src - shift)                # (1, n_src_pad) f32, values <= 1

    # ---------------- stage 2: masked aggregation matmul ---------------------
    n_dst_tiles = n_dst_pad // tile_dst
    n_src_tiles = n_src_pad // tile_src

    z_bytes = n_src_pad * d_pad * 2
    resident_z = (2 * z_bytes) <= 20 * 2**20      # fits comfortably even on v7x
    if resident_z:
        z_spec = pl.BlockSpec((n_src_pad, d_pad), lambda i, j: (0, 0))
        z_buf_bytes = 2 * z_bytes
    else:
        z_spec = pl.BlockSpec((tile_src, d_pad), lambda i, j: (j, 0))
        z_buf_bytes = 2 * tile_src * d_pad * 2

    vmem_need = (2 * tile_dst * tile_src          # adj int8, double-buffered
                 + 2 * tile_src * 4               # src weight row f32
                 + z_buf_bytes                    # z (resident or streamed)
                 + 2 * tile_dst * d_pad * 4)      # f32 output block
    # Cap below v7x's 64 MiB physical VMEM to leave compiler headroom.
    vmem_limit = int(min(48 * 2**20, max(16 * 2**20, vmem_need + (4 << 20))))

    out_pad = pl.pallas_call(
        make_attn_kernel(out_dim, tile_src, resident_z),
        out_shape=jax.ShapeDtypeStruct((n_dst_pad, d_pad), jnp.float32),
        grid_spec=pltpu.PrefetchScalarGridSpec(
            num_scalar_prefetch=0,
            grid=(n_dst_tiles, n_src_tiles),
            in_specs=[pl.BlockSpec((tile_dst, tile_src), lambda i, j: (i, j)),
                      pl.BlockSpec((1, tile_src), lambda i, j: (0, j)),
                      z_spec],
            out_specs=pl.BlockSpec((tile_dst, d_pad), lambda i, j: (i, 0))),
        compiler_params=pltpu.CompilerParams(
            dimension_semantics=("parallel", "arbitrary"),
            vmem_limit_bytes=vmem_limit),
        cost_estimate=pl.CostEstimate(
            flops=int(2 * n_dst_pad * n_src_pad * d_pad
                      + 2 * n_dst_pad * n_src_pad),
            transcendentals=0,
            bytes_accessed=int(n_dst_pad * n_src_pad
                               + (z_bytes if resident_z
                                  else n_dst_tiles * z_bytes)
                               + n_dst_pad * d_pad * 4 + n_src_pad * 4)),
    )(adj_p, src_w, z_pad)

    return out_pad[:N, :out_dim]


def graph_layer_ref(h, w_fc, a_attn, adj_dst):
    """Pure-JAX f32 reference of the literal DGL semantics (dst-major adjacency)."""
    out_dim = w_fc.shape[1]
    z = h @ w_fc
    e_src = z @ a_attn[:out_dim]                  # (N, 1)
    e_dst = z @ a_attn[out_dim:]                  # (N, 1)
    e = e_dst + e_src.T                           # e[v, u]
    mask = adj_dst > 0
    e = jnp.where(mask, e, -1e30)
    m = jnp.max(e, axis=1, keepdims=True)
    p = jnp.where(mask, jnp.exp(e - m), 0.0)
    alpha = p / jnp.sum(p, axis=1, keepdims=True)  # softmax over incoming edges
    return alpha @ z


if __name__ == "__main__":
    # 1024 nodes exercises the real default tiling: stage-2 grid (4, 2) with
    # 256x512 blocks, multi-step accumulation along the src axis, resident z.
    N, in_dim, out_dim = 1024, 16, 32
    key = jax.random.PRNGKey(0)
    k_h, k_w, k_a = jax.random.split(key, 3)

    h = jax.random.normal(k_h, (N, in_dim), dtype=jnp.float32)
    # nn.Linear(in_dim, out_dim, bias=False).weight is (out_dim, in_dim); pass its T.
    w_fc = jax.random.normal(k_w, (in_dim, out_dim), dtype=jnp.float32) * 0.1
    # nn.Linear(2*out_dim, 1, bias=False).weight is (1, 2*out_dim); pass its T.
    a_attn = jax.random.normal(k_a, (2 * out_dim, 1), dtype=jnp.float32) * 0.1

    # Deterministic graph, dst-major int8: node v receives edges from v
    # (self-loop), (v-1) % N and (v-3) % N (every node has >= 1 incoming edge,
    # as DGL's reduce requires).
    v_ids = jnp.arange(N)
    adj_dst = jnp.zeros((N, N), dtype=jnp.int8)
    adj_dst = adj_dst.at[v_ids, v_ids].set(1)
    adj_dst = adj_dst.at[v_ids, (v_ids - 1) % N].set(1)
    adj_dst = adj_dst.at[v_ids, (v_ids - 3) % N].set(1)

    out = graph_layer(h, w_fc, a_attn, adj_dst)
    out = jax.block_until_ready(out)

    ref = graph_layer_ref(h, w_fc, a_attn, adj_dst)
    assert out.shape == (N, out_dim)
    max_err = jnp.max(jnp.abs(out - ref))
    # bf16 matmuls + approx reciprocal => slightly looser tolerance than pure f32.
    assert jnp.allclose(out, ref, atol=2e-2, rtol=2e-2), (
        f"mismatch vs reference (max abs err {max_err})")

    print("KERNEL_OK")
</pallas_src>

<mosaic_0001>
module attributes {stable_mosaic.version = 11 : i64} {
  func.func @project_kernel(%arg0: i32, %arg1: memref<512x16xbf16, #tpu.memory_space<vmem>>, %arg2: memref<16x128xbf16, #tpu.memory_space<vmem>>, %arg3: memref<1x128xf32, #tpu.memory_space<vmem>>, %arg4: memref<1x128xf32, #tpu.memory_space<vmem>>, %arg5: memref<512x128xbf16, #tpu.memory_space<vmem>>, %arg6: memref<1x512xf32, #tpu.memory_space<vmem>>) attributes {dimension_semantics = [#tpu.dimension_semantics<parallel>], iteration_bounds = array<i64: 2>, scalar_prefetch = 0 : i64, scratch_operands = 0 : i64, tpu.core_type = #tpu.core_type<tc>, window_params = [{transform_indices = @transform_0, window_bounds = array<i64: 512, 16>}, {pipeline_mode = #tpu.pipeline_mode<synchronous>, transform_indices = @transform_1, window_bounds = array<i64: 16, 128>}, {pipeline_mode = #tpu.pipeline_mode<synchronous>, transform_indices = @transform_2, window_bounds = array<i64: 1, 128>}, {pipeline_mode = #tpu.pipeline_mode<synchronous>, transform_indices = @transform_3, window_bounds = array<i64: 1, 128>}, {transform_indices = @transform_4, window_bounds = array<i64: 512, 128>}, {transform_indices = @transform_5, window_bounds = array<i64: 1, 512>}]} {
    %c0 = arith.constant 0 : index
    %c0_0 = arith.constant 0 : index
    %0 = vector.load %arg1[%c0, %c0_0] : memref<512x16xbf16, #tpu.memory_space<vmem>>, vector<512x16xbf16>
    %c0_1 = arith.constant 0 : index
    %c0_2 = arith.constant 0 : index
    %1 = vector.load %arg2[%c0_1, %c0_2] : memref<16x128xbf16, #tpu.memory_space<vmem>>, vector<16x128xbf16>
    %cst = arith.constant dense<0.000000e+00> : vector<512x128xf32>
    %2 = tpu.matmul %0, %1, %cst {dimension_numbers = #tpu.dot_dimension_numbers<[1], [0], [0], [1], [0, 0, 1, 1], [], []>} : vector<512x16xbf16>, vector<16x128xbf16>, vector<512x128xf32> -> vector<512x128xf32>
    %c0_3 = arith.constant 0 : index
    %c0_4 = arith.constant 0 : index
    %3 = vector.load %arg3[%c0_3, %c0_4] : memref<1x128xf32, #tpu.memory_space<vmem>>, vector<1x128xf32>
    %cst_5 = arith.constant dense<0.000000e+00> : vector<1x512xf32>
    %4 = tpu.matmul %3, %2, %cst_5 {dimension_numbers = #tpu.dot_dimension_numbers<[1], [1], [0], [0], [0, 0, 1, 0], [], []>} : vector<1x128xf32>, vector<512x128xf32>, vector<1x512xf32> -> vector<1x512xf32>
    %c0_6 = arith.constant 0 : index
    %c0_7 = arith.constant 0 : index
    %5 = vector.load %arg6[%c0_6, %c0_7] : memref<1x512xf32, #tpu.memory_space<vmem>>, vector<1x512xf32>
    tpu.vector_store %arg6[%c0_6, %c0_7], %4 {strides = array<i32>} : memref<1x512xf32, #tpu.memory_space<vmem>>, vector<1x512xf32>,
    %c0_8 = arith.constant 0 : index
    %c0_9 = arith.constant 0 : index
    %6 = vector.load %arg4[%c0_8, %c0_9] : memref<1x128xf32, #tpu.memory_space<vmem>>, vector<1x128xf32>
    %7 = vector.broadcast %6 : vector<1x128xf32> to vector<512x128xf32>
    %8 = arith.addf %2, %7 : vector<512x128xf32>
    %9 = arith.truncf %8 : vector<512x128xf32> to vector<512x128xbf16>
    %c0_10 = arith.constant 0 : index
    %c0_11 = arith.constant 0 : index
    %10 = vector.load %arg5[%c0_10, %c0_11] : memref<512x128xbf16, #tpu.memory_space<vmem>>, vector<512x128xbf16>
    tpu.vector_store %arg5[%c0_10, %c0_11], %9 {strides = array<i32>} : memref<512x128xbf16, #tpu.memory_space<vmem>>, vector<512x128xbf16>,
    return
  }
  func.func @transform_0(%arg0: i32) -> (i32, i32) {
    %c0_i32 = arith.constant 0 : i32
    %c0_i32_0 = arith.constant 0 : i32
    return %arg0, %c0_i32 : i32, i32
  }
  func.func @transform_1(%arg0: i32) -> (i32, i32) {
    %c0_i32 = arith.constant 0 : i32
    %c0_i32_0 = arith.constant 0 : i32
    %c0_i32_1 = arith.constant 0 : i32
    return %c0_i32, %c0_i32_0 : i32, i32
  }
  func.func @transform_2(%arg0: i32) -> (i32, i32) {
    %c0_i32 = arith.constant 0 : i32
    %c0_i32_0 = arith.constant 0 : i32
    %c0_i32_1 = arith.constant 0 : i32
    return %c0_i32, %c0_i32_0 : i32, i32
  }
  func.func @transform_3(%arg0: i32) -> (i32, i32) {
    %c0_i32 = arith.constant 0 : i32
    %c0_i32_0 = arith.constant 0 : i32
    %c0_i32_1 = arith.constant 0 : i32
    return %c0_i32, %c0_i32_0 : i32, i32
  }
  func.func @transform_4(%arg0: i32) -> (i32, i32) {
    %c0_i32 = arith.constant 0 : i32
    %c0_i32_0 = arith.constant 0 : i32
    return %arg0, %c0_i32 : i32, i32
  }
  func.func @transform_5(%arg0: i32) -> (i32, i32) {
    %c0_i32 = arith.constant 0 : i32
    %c0_i32_0 = arith.constant 0 : i32
    return %c0_i32, %arg0 : i32, i32
  }
}

</mosaic_0001>

<bundles_post_ra>
// kernel: tpu_custom_call.1
= control target key start
LH: loop header
LB: loop body
LE: loop exit
PB: predicated region body
PF: predicated region fallthrough
CT: control target
= control target key end

     0   :  { %11 = vsyncpa [#allocation3], 0  ;;  %s2896_s0 = inlined_call_operand.vmem [shape: bf16[1024,16], index: 0, kind: input, shape index: {}]   ;;  %s2897_s1 = inlined_call_operand.vmem [shape: bf16[16,128], index: 1, kind: input, shape index: {}]   ;;  %s2898_s2 = inlined_call_operand.vmem [shape: f32[1,128], index: 2, kind: input, shape index: {}]   ;;  %s2899_s3 = inlined_call_operand.vmem [shape: f32[1,128], index: 3, kind: input, shape index: {}]   ;;  %s2900_s4 = inlined_call_operand.hbm [shape: bf16[1024,128], index: 4, kind: output, shape index: {0}]   ;;  %s2901_s5 = inlined_call_operand.hbm [shape: f32[1,1024], index: 5, kind: output, shape index: {1}]  }
   0x1   :  { %13 = vsyncpa [#allocation3 + $0x1], 0 }
   0x2   :  { %14 = vsyncpa [#allocation5], 0 }
   0x3   :  { %16 = vsyncpa [#allocation5 + $0x1], 0  ;;  %s2397_s18 = smov 0   ;;  %s2399_s19 = smov 0  }
   0x4   :  { %s2401_s20 = smov 0   ;;  %s2403_s21 = smov 0  }
   0x5 LB: > { %s2418_s22 = sadd.s32 4294967295, %s2360_s21   ;;  %s1552_s23 = sadd.s32 4294967294, %s2360_s21   ;;  %s2360_s21 = sphi %s2403_s21, %s2907_s21   ;;  %s2356_s20 = sphi %s2401_s20, %s2906_s20   ;;  %s2352_s19 = sphi %s2399_s19, %s2905_s19   ;;  %s2348_s18 = sphi %s2397_s18, %s2904_s18  }
   0x6   : > { %s2422_s24 = sadd.s32 1, %s2360_s21   ;;  %s118_s25 = sadd.s32 1, %s2356_s20 }
   0x7   : > { %s115_s26 = ssub.s32 %s2360_s21, %s2422_s24  ;;  %p128_p0 = scmp.ne.s32.totalorder %s2356_s20, %s2352_s19 }
   0x8   : > { %p116_p1 = scmp.eq.s32.totalorder %s115_s26, 0  ;;  %p129_p2 = scmp.eq.s32.totalorder %s2418_s22, 1 }
   0x9   : > { %p134_p3 = scmp.ne.s32.totalorder %s2352_s19, %s2348_s18  ;;  %p135_p4 = scmp.eq.s32.totalorder %s1552_s23, 1 }
   0xa   : > { %s2433_s27 = scalar_select %p116_p1, %s2356_s20, %s118_s25  }
   0xb   : > { %p2435_p5 = por %p129_p2, %p128_p0  ;;  %p2439_p6 = por %p135_p4, %p134_p3 }
   0xc   : > { %p1555_p7 = scmp.ge.s32.totalorder %s2360_s21, 1  ;;  %p197_p8 = scmp.lt.s32.totalorder %s2360_s21, 3 }
   0xe   : > { %p198_p9 = pnand %p1555_p7, %p197_p8 }
   0xf   : > { %v2233_v0 = vld [vmem:[%s2897_s1] sm:$0xff] (!%p198_p9)   ;;  %s2449_s7 = sshll.u32 (!%p198_p9), %s2418_s22, 6  ;;  %vm471_vm0 = vcmask (!%p198_p9), 130048   ;;  %s2529_s15 = sand.u32 (!%p198_p9), 1, %s2352_s19  }
  0x10   : > { %201 = sbr.rel (%p198_p9) target bundleno = 641 (0x281), region = 36  ;;  %p231_p10 = scmp.lt.s32.totalorder (!%p198_p9), %s2449_s7, 127  ;;  %2056 = vmatprep.subr.bf16.mxu0 (!%p198_p9), %v2233_v0  ;;  %v2525_v33 = vld [vmem:[%s2898_s2] sm:$0x1] (!%p198_p9) }
  0x11   : > { %2057 = vmatpush3.bf16.msra.mxu0 (!%p198_p9), %v2233_v0  ;;  %2020 = vmatprep.mubr.f32.mxu1 (!%p198_p9), %v2525_v33  ;;  %v2536_v35 = vld [vmem:[%s2899_s3] ss:$0 sm:$0xff] (!%p198_p9)  ;;  %s1556_s23 = sshll.u32 (!%p198_p9), %s2529_s15, 8  ;;  %s1762_s26 = sshll.u32 (!%p198_p9), %s2418_s22, 12 }
  0x12   : > { %s2557_s25 = scalar_lea.vmem (!%p198_p9), [#allocation2], %s1556_s23  ;;  %s1426_s10 = scalar_lea.sflag (!%p198_p9), [#allocation3], %s2529_s15 }
  0x17   : > { %s232_s8 = scalar_select %p231_p10, %s2449_s7, 127 }
  0x19   : > { %s1559_s9 = sshll.u32 %s232_s8, 2  ;;  %s2819_s8 = scalar_lea.hbm %s2900_s4, %s1762_s26 }
  0x1a   : > { %s2456_s12 = scalar_lea.vmem %s2896_s0, %s1559_s9  ;;  %s1444_s9 = sshll.u32 %s2557_s25, 4  ;;  %s2822_s9 = int_to_ptr.vmem [resolvable:$true] %s1444_s9 }
  0x1b   : > { %v2234_v1 = vld [vmem:[%s2456_s12] sm:$0xff]   ;;  %v2235_v2 = vld [vmem:[%s2456_s12 + $0x8] sm:$0xff]   ;;  %v2236_v3 = vld [vmem:[%s2456_s12 + $0x10] sm:$0xff]   ;;  %s2266_s11 = scalar_lea.vmem %s2822_s9, 4096 }
  0x1c   : > { %2058 = vmatprep.mubr.msk.bf16.mxu0 %vm471_vm0, %v2234_v1  ;;  %v2237_v4 = vld [vmem:[%s2456_s12 + $0x18] sm:$0xff]   ;;  %v2238_v5 = vld [vmem:[%s2456_s12 + $0x20] sm:$0xff]   ;;  %v2239_v6 = vld [vmem:[%s2456_s12 + $0x28] sm:$0xff]   ;;  %p2267_p11 = scmp.ne.s32.totalorder %s2822_s9, %s2266_s11 }
  0x1d   : > { %2059 = vmatmul.mubr.msk.bf16.vlgmr.msra.gmra.mrb[0].mxu0 %vm471_vm0, %v2235_v2  ;;  %v2240_v7 = vld [vmem:[%s2456_s12 + $0x30] sm:$0xff]   ;;  %v2241_v8 = vld [vmem:[%s2456_s12 + $0x38] sm:$0xff]   ;;  %v2242_v9 = vld [vmem:[%s2456_s12 + $0x40] sm:$0xff]  }
  0x1e   : > { %2062 = vmatprep.mubr.msk.bf16.mxu0 %vm471_vm0, %v2236_v3  ;;  %v2243_v10 = vld [vmem:[%s2456_s12 + $0x48] sm:$0xff]   ;;  %v2244_v11 = vld [vmem:[%s2456_s12 + $0x50] sm:$0xff]   ;;  %v2245_v12 = vld [vmem:[%s2456_s12 + $0x58] sm:$0xff]   ;;  %p2268_p12 = pnand %p2267_p11, %p2435_p5 }
  0x1f   : > { %v2246_v13 = vld [vmem:[%s2456_s12 + $0x60] sm:$0xff]   ;;  %v2247_v14 = vld [vmem:[%s2456_s12 + $0x68] sm:$0xff]   ;;  %v2248_v15 = vld [vmem:[%s2456_s12 + $0x70] sm:$0xff]  }
  0x20   : > { %v2249_v16 = vld [vmem:[%s2456_s12 + $0x78] sm:$0xff]   ;;  %v2250_v17 = vld [vmem:[%s2456_s12 + $0x80] sm:$0xff]   ;;  %v2251_v18 = vld [vmem:[%s2456_s12 + $0x88] sm:$0xff]   ;;  %p2269_p13 = pneg %p2268_p12 }
  0x21   : > { %v2252_v19 = vld [vmem:[%s2456_s12 + $0x90] sm:$0xff]   ;;  %v2253_v20 = vld [vmem:[%s2456_s12 + $0x98] sm:$0xff]   ;;  %v2254_v21 = vld [vmem:[%s2456_s12 + $0xa0] sm:$0xff]  }
  0x22   : > { %v2255_v22 = vld [vmem:[%s2456_s12 + $0xa8] sm:$0xff]   ;;  %v2256_v23 = vld [vmem:[%s2456_s12 + $0xb0] sm:$0xff]   ;;  %v2257_v24 = vld [vmem:[%s2456_s12 + $0xb8] sm:$0xff]  }
  0x23   : > { %v2258_v25 = vld [vmem:[%s2456_s12 + $0xc0] sm:$0xff]   ;;  %v2259_v26 = vld [vmem:[%s2456_s12 + $0xc8] sm:$0xff]   ;;  %v2260_v27 = vld [vmem:[%s2456_s12 + $0xd0] sm:$0xff]  }
  0x24   : > { %v2261_v28 = vld [vmem:[%s2456_s12 + $0xd8] sm:$0xff]   ;;  %v2262_v29 = vld [vmem:[%s2456_s12 + $0xe0] sm:$0xff]   ;;  %v2263_v30 = vld [vmem:[%s2456_s12 + $0xe8] sm:$0xff]  }
  0x25   : > { %2063 = vmatmul.mubr.msk.bf16.gmra.mrb[4].mxu0 %vm471_vm0, %v2237_v4  ;;  %v2264_v31 = vld [vmem:[%s2456_s12 + $0xf0] sm:$0xff]   ;;  %v2265_v32 = vld [vmem:[%s2456_s12 + $0xf8] sm:$0xff]   ;;  %s2362_s12 = smov [#allocation2]  }
  0x26   : > { %2066 = vmatprep.mubr.msk.bf16.mxu0 %vm471_vm0, %v2238_v5  ;;  %s2270_s13 = sshll.u32 %s2362_s12, 4  ;;  %s2271_s13 = int_to_ptr.vmem [resolvable:$false] %s2270_s13 }
  0x27   : > { %s2272_s22 = scalar_lea.vmem %s2271_s13, 8192  ;;  %p2273_p0 = scmp.lt.s32.totalorder %s2822_s9, %s2271_s13 }
  0x28   : > { %p2274_p1 = scmp.lt.s32.totalorder %s2272_s22, %s2266_s11 }
  0x2a   : > { %p2275_p2 = por %p2274_p1, %p2273_p0 }
  0x2c   : > { %p2276_p3 = pnand %p2275_p2, %p2269_p13 }
  0x2d   : > { %2067 = vmatmul.mubr.msk.bf16.gmra.mrb[8].mxu0 %vm471_vm0, %v2239_v6 }
  0x2e   : > { %2070 = vmatprep.mubr.msk.bf16.mxu0 %vm471_vm0, %v2240_v7 }
  0x35   : > { %2071 = vmatmul.mubr.msk.bf16.gmra.mrb[12].mxu0 %vm471_vm0, %v2241_v8 }
  0x36   : > { %2074 = vmatprep.mubr.msk.bf16.mxu0 %vm471_vm0, %v2242_v9 }
  0x3d   : > { %2075 = vmatmul.mubr.msk.bf16.gmra.mrb[16].mxu0 %vm471_vm0, %v2243_v10 }
  0x3e   : > { %2078 = vmatprep.mubr.msk.bf16.mxu0 %vm471_vm0, %v2244_v11 }
  0x45   : > { %2079 = vmatmul.mubr.msk.bf16.gmra.mrb[20].mxu0 %vm471_vm0, %v2245_v12 }
  0x46   : > { %2082 = vmatprep.mubr.msk.bf16.mxu0 %vm471_vm0, %v2246_v13 }
  0x4d   : > { %2083 = vmatmul.mubr.msk.bf16.gmra.mrb[24].mxu0 %vm471_vm0, %v2247_v14 }
  0x4e   : > { %2086 = vmatprep.mubr.msk.bf16.mxu0 %vm471_vm0, %v2248_v15 }
  0x55   : > { %2087 = vmatmul.mubr.msk.bf16.gmra.mrb[28].mxu0 %vm471_vm0, %v2249_v16 }
  0x56   : > { %2090 = vmatprep.mubr.msk.bf16.mxu0 %vm471_vm0, %v2250_v17 }
  0x5d   : > { %2091 = vmatmul.mubr.msk.bf16.gmra.mrb[32].mxu0 %vm471_vm0, %v2251_v18 }
  0x5e   : > { %2094 = vmatprep.mubr.msk.bf16.mxu0 %vm471_vm0, %v2252_v19 }
  0x65   : > { %2095 = vmatmul.mubr.msk.bf16.gmra.mrb[36].mxu0 %vm471_vm0, %v2253_v20 }
  0x66   : > { %2098 = vmatprep.mubr.msk.bf16.mxu0 %vm471_vm0, %v2254_v21 }
  0x6d   : > { %2099 = vmatmul.mubr.msk.bf16.gmra.mrb[40].mxu0 %vm471_vm0, %v2255_v22 }
  0x6e   : > { %2102 = vmatprep.mubr.msk.bf16.mxu0 %vm471_vm0, %v2256_v23 }
  0x75   : > { %2103 = vmatmul.mubr.msk.bf16.gmra.mrb[44].mxu0 %vm471_vm0, %v2257_v24 }
  0x76   : > { %2106 = vmatprep.mubr.msk.bf16.mxu0 %vm471_vm0, %v2258_v25 }
  0x7d   : > { %2107 = vmatmul.mubr.msk.bf16.gmra.mrb[48].mxu0 %vm471_vm0, %v2259_v26 }
  0x7e   : > { %2110 = vmatprep.mubr.msk.bf16.mxu0 %vm471_vm0, %v2260_v27 }
  0x85   : > { %2111 = vmatmul.mubr.msk.bf16.gmra.mrb[52].mxu0 %vm471_vm0, %v2261_v28 }
  0x86   : > { %2114 = vmatprep.mubr.msk.bf16.mxu0 %vm471_vm0, %v2262_v29 }
  0x8d   : > { %2115 = vmatmul.mubr.msk.bf16.gmra.mrb[56].mxu0 %vm471_vm0, %v2263_v30 }
  0x8e   : > { %2118 = vmatprep.mubr.msk.bf16.mxu0 %vm471_vm0, %v2264_v31 }
  0x95   : > { %2119 = vmatmul.mubr.msk.bf16.gmra.mrb[60].mxu0 %vm471_vm0, %v2265_v32 }
  0xf0   : > { %v2531_v34 = vpop.f32.mrb[0].mxu0 }
  0xf1   : > { %v2538_v36 = vpop.f32.mrb[1].mxu0  ;;  %v1043_v38 = vadd.f32 %v2531_v34, %v2536_v35 }
  0xf2   : > { %v2541_v37 = vpop.f32.mrb[2].mxu0  ;;  %v1041_v42 = vadd.f32 %v2536_v35, %v2538_v36 }
  0xf3   : > { %v2128_v39 = vpack.c.bf16 %v2541_v37, %v2531_v34  ;;  %v1044_v40 = vadd.f32 %v2541_v37, %v2536_v35  ;;  %v2549_v41 = vpop.f32.mrb[3].mxu0 }
  0xf4   : > { %v1042_v43 = vadd.f32 %v2536_v35, %v2549_v41  ;;  %v2124_v44 = vpack.c.bf16 %v2549_v41, %v2538_v36 }
  0xf5   : > { %v1772_v45 = vpack.c.bf16 %v1044_v40, %v1043_v38 }
  0xf6   : > { %v1767_v46 = vpack.c.bf16 %v1042_v43, %v1041_v42 }
  0xf7   : > { %1924 = vst [vmem:[%s2557_s25 + $0x8] sm:$0xff] %v1772_v45  }
  0xf8   : > { %1768 = vst [vmem:[%s2557_s25] sm:$0xff] %v1767_v46   ;;  %v2561_v47 = vpop.f32.mrb[4].mxu0 }
  0xf9   : > { %v2563_v48 = vpop.f32.mrb[5].mxu0  ;;  %v1047_v50 = vadd.f32 %v2561_v47, %v2536_v35 }
  0xfa   : > { %v2565_v49 = vpop.f32.mrb[6].mxu0  ;;  %v1045_v54 = vadd.f32 %v2536_v35, %v2563_v48 }
  0xfb   : > { %v2136_v51 = vpack.c.bf16 %v2565_v49, %v2561_v47  ;;  %v1048_v52 = vadd.f32 %v2565_v49, %v2536_v35  ;;  %v2573_v53 = vpop.f32.mrb[7].mxu0 }
  0xfc   : > { %v2132_v55 = vpack.c.bf16 %v2573_v53, %v2563_v48  ;;  %v1046_v56 = vadd.f32 %v2536_v35, %v2573_v53 }
  0xfd   : > { %v1782_v57 = vpack.c.bf16 %v1048_v52, %v1047_v50 }
  0xfe   : > { %v1777_v58 = vpack.c.bf16 %v1046_v56, %v1045_v54 }
  0xff   : > { %1926 = vst [vmem:[%s2557_s25 + $0x18] sm:$0xff] %v1782_v57  }
 0x100   : > { %1925 = vst [vmem:[%s2557_s25 + $0x10] sm:$0xff] %v1777_v58   ;;  %v2583_v59 = vpop.f32.mrb[8].mxu0 }
 0x101   : > { %v2585_v60 = vpop.f32.mrb[9].mxu0  ;;  %v1051_v62 = vadd.f32 %v2583_v59, %v2536_v35 }
 0x102   : > { %v2587_v61 = vpop.f32.mrb[10].mxu0  ;;  %v1049_v2 = vadd.f32 %v2536_v35, %v2585_v60 }
 0x103   : > { %v2144_v63 = vpack.c.bf16 %v2587_v61, %v2583_v59  ;;  %v1052_v0 = vadd.f32 %v2587_v61, %v2536_v35  ;;  %v2595_v1 = vpop.f32.mrb[11].mxu0 }
 0x104   : > { %v2140_v3 = vpack.c.bf16 %v2595_v1, %v2585_v60  ;;  %v1050_v4 = vadd.f32 %v2536_v35, %v2595_v1 }
 0x105   : > { %v1792_v5 = vpack.c.bf16 %v1052_v0, %v1051_v62 }
 0x106   : > { %v1787_v6 = vpack.c.bf16 %v1050_v4, %v1049_v2 }
 0x107   : > { %1928 = vst [vmem:[%s2557_s25 + $0x28] sm:$0xff] %v1792_v5  }
 0x108   : > { %1927 = vst [vmem:[%s2557_s25 + $0x20] sm:$0xff] %v1787_v6   ;;  %v2605_v7 = vpop.f32.mrb[12].mxu0 }
 0x109   : > { %v2607_v8 = vpop.f32.mrb[13].mxu0  ;;  %v1055_v10 = vadd.f32 %v2605_v7, %v2536_v35 }
 0x10a   : > { %v2609_v9 = vpop.f32.mrb[14].mxu0  ;;  %v1053_v14 = vadd.f32 %v2536_v35, %v2607_v8 }
 0x10b   : > { %v2152_v11 = vpack.c.bf16 %v2609_v9, %v2605_v7  ;;  %v1056_v12 = vadd.f32 %v2609_v9, %v2536_v35  ;;  %v2617_v13 = vpop.f32.mrb[15].mxu0 }
 0x10c   : > { %v2148_v15 = vpack.c.bf16 %v2617_v13, %v2607_v8  ;;  %v1054_v16 = vadd.f32 %v2536_v35, %v2617_v13 }
 0x10d   : > { %v1802_v17 = vpack.c.bf16 %v1056_v12, %v1055_v10 }
 0x10e   : > { %v1797_v18 = vpack.c.bf16 %v1054_v16, %v1053_v14 }
 0x10f   : > { %1930 = vst [vmem:[%s2557_s25 + $0x38] sm:$0xff] %v1802_v17  }
 0x110   : > { %1929 = vst [vmem:[%s2557_s25 + $0x30] sm:$0xff] %v1797_v18   ;;  %v2076_v19 = vpop.f32.mrb[16].mxu0 }
 0x111   : > { %v666_v20 = vpop.f32.mrb[17].mxu0  ;;  %v1059_v22 = vadd.f32 %v2076_v19, %v2536_v35 }
 0x112   : > { %v2077_v21 = vpop.f32.mrb[18].mxu0  ;;  %v1057_v26 = vadd.f32 %v2536_v35, %v666_v20 }
 0x113   : > { %v2126_v23 = vpack.c.bf16 %v2077_v21, %v2076_v19  ;;  %v1060_v24 = vadd.f32 %v2077_v21, %v2536_v35  ;;  %v669_v25 = vpop.f32.mrb[19].mxu0 }
 0x114   : > { %v1058_v27 = vadd.f32 %v2536_v35, %v669_v25  ;;  %v2122_v28 = vpack.c.bf16 %v669_v25, %v666_v20 }
 0x115   : > { %v1812_v29 = vpack.c.bf16 %v1060_v24, %v1059_v22 }
 0x116   : > { %v1807_v30 = vpack.c.bf16 %v1058_v27, %v1057_v26  ;;  %2123 = vmatprep.subr.bf16.mxu1 %v2122_v28 }
 0x117   : > { %1932 = vst [vmem:[%s2557_s25 + $0x48] sm:$0xff] %v1812_v29   ;;  %2125 = vmatpush3.bf16.xpose.msra.mxu1 %v2124_v44 }
 0x118   : > { %1931 = vst [vmem:[%s2557_s25 + $0x40] sm:$0xff] %v1807_v30   ;;  %v2080_v31 = vpop.f32.mrb[20].mxu0  ;;  %2127 = vmatprep.subr.bf16.mxu1 %v2126_v23 }
 0x119   : > { %v682_v32 = vpop.f32.mrb[21].mxu0  ;;  %v1063_v38 = vadd.f32 %v2080_v31, %v2536_v35 }
 0x11a   : > { %v2081_v36 = vpop.f32.mrb[22].mxu0  ;;  %v1061_v43 = vadd.f32 %v2536_v35, %v682_v32 }
 0x11b   : > { %v2134_v40 = vpack.c.bf16 %v2081_v36, %v2080_v31  ;;  %v1064_v41 = vadd.f32 %v2081_v36, %v2536_v35  ;;  %v685_v42 = vpop.f32.mrb[23].mxu0 }
 0x11c   : > { %v2130_v45 = vpack.c.bf16 %v685_v42, %v682_v32  ;;  %v1062_v46 = vadd.f32 %v2536_v35, %v685_v42 }
 0x11d   : > { %v1822_v50 = vpack.c.bf16 %v1064_v41, %v1063_v38 }
 0x11e   : > { %v1817_v52 = vpack.c.bf16 %v1062_v46, %v1061_v43 }
 0x11f   : > { %1934 = vst [vmem:[%s2557_s25 + $0x58] sm:$0xff] %v1822_v50   ;;  %2129 = vmatpush3.bf16.xpose.msra.mxu1 %v2128_v39 }
 0x120   : > { %1933 = vst [vmem:[%s2557_s25 + $0x50] sm:$0xff] %v1817_v52   ;;  %v2084_v44 = vpop.f32.mrb[24].mxu0  ;;  %2131 = vmatprep.subr.bf16.mxu1 %v2130_v45 }
 0x121   : > { %v698_v54 = vpop.f32.mrb[25].mxu0  ;;  %v1067_v57 = vadd.f32 %v2084_v44, %v2536_v35 }
 0x122   : > { %v2085_v56 = vpop.f32.mrb[26].mxu0  ;;  %v1065_v2 = vadd.f32 %v2536_v35, %v698_v54 }
 0x123   : > { %v2142_v58 = vpack.c.bf16 %v2085_v56, %v2084_v44  ;;  %v1068_v62 = vadd.f32 %v2085_v56, %v2536_v35  ;;  %v701_v0 = vpop.f32.mrb[27].mxu0 }
 0x124   : > { %v2138_v4 = vpack.c.bf16 %v701_v0, %v698_v54  ;;  %v1066_v5 = vadd.f32 %v2536_v35, %v701_v0 }
 0x125   : > { %v1832_v34 = vpack.c.bf16 %v1068_v62, %v1067_v57 }
 0x126   : > { %v1827_v37 = vpack.c.bf16 %v1066_v5, %v1065_v2 }
 0x127   : > { %1936 = vst [vmem:[%s2557_s25 + $0x68] sm:$0xff] %v1832_v34   ;;  %2133 = vmatpush3.bf16.xpose.msra.mxu1 %v2132_v55 }
 0x128   : > { %1935 = vst [vmem:[%s2557_s25 + $0x60] sm:$0xff] %v1827_v37   ;;  %v2651_v39 = vpop.f32.mrb[28].mxu0  ;;  %2135 = vmatprep.subr.bf16.mxu1 %v2134_v40 }
 0x129   : > { %v714_v6 = vpop.f32.mrb[29].mxu0  ;;  %v1071_v12 = vadd.f32 %v2651_v39, %v2536_v35 }
 0x12a   : > { %v2089_v10 = vpop.f32.mrb[30].mxu0  ;;  %v1069_v18 = vadd.f32 %v2536_v35, %v714_v6 }
 0x12b   : > { %v2150_v14 = vpack.c.bf16 %v2089_v10, %v2651_v39  ;;  %v1072_v16 = vadd.f32 %v2089_v10, %v2536_v35  ;;  %v717_v17 = vpop.f32.mrb[31].mxu0 }
 0x12c   : > { %v2146_v48 = vpack.c.bf16 %v717_v17, %v714_v6  ;;  %v1070_v53 = vadd.f32 %v2536_v35, %v717_v17 }
 0x12d   : > { %v1842_v55 = vpack.c.bf16 %v1072_v16, %v1071_v12 }
 0x12e   : > { %v1837_v19 = vpack.c.bf16 %v1070_v53, %v1069_v18 }
 0x12f   : > { %1938 = vst [vmem:[%s2557_s25 + $0x78] sm:$0xff] %v1842_v55   ;;  %2137 = vmatpush3.bf16.xpose.msra.mxu1 %v2136_v51 }
 0x130   : > { %1937 = vst [vmem:[%s2557_s25 + $0x70] sm:$0xff] %v1837_v19   ;;  %v2664_v20 = vpop.f32.mrb[32].mxu0  ;;  %2139 = vmatprep.subr.bf16.mxu1 %v2138_v4 }
 0x131   : > { %v2666_v21 = vpop.f32.mrb[33].mxu0  ;;  %v1075_v23 = vadd.f32 %v2664_v20, %v2536_v35 }
 0x132   : > { %v2668_v22 = vpop.f32.mrb[34].mxu0  ;;  %v1073_v51 = vadd.f32 %v2536_v35, %v2666_v21 }
 0x133   : > { %v2160_v24 = vpack.c.bf16 %v2668_v22, %v2664_v20  ;;  %v1076_v47 = vadd.f32 %v2668_v22, %v2536_v35  ;;  %v2676_v49 = vpop.f32.mrb[35].mxu0 }
 0x134   : > { %v2156_v25 = vpack.c.bf16 %v2676_v49, %v2666_v21  ;;  %v1074_v26 = vadd.f32 %v2536_v35, %v2676_v49 }
 0x135   : > { %v1852_v27 = vpack.c.bf16 %v1076_v47, %v1075_v23 }
 0x136   : > { %v1847_v28 = vpack.c.bf16 %v1074_v26, %v1073_v51 }
 0x137   : > { %1940 = vst [vmem:[%s2557_s25 + $0x88] sm:$0xff] %v1852_v27   ;;  %2141 = vmatpush3.bf16.xpose.msra.mxu1 %v2140_v3 }
 0x138   : > { %1939 = vst [vmem:[%s2557_s25 + $0x80] sm:$0xff] %v1847_v28   ;;  %v2689_v29 = vpop.f32.mrb[36].mxu0  ;;  %2143 = vmatprep.subr.bf16.mxu1 %v2142_v58 }
 0x139   : > { %v2691_v30 = vpop.f32.mrb[37].mxu0  ;;  %v1079_v32 = vadd.f32 %v2689_v29, %v2536_v35 }
 0x13a   : > { %v2693_v31 = vpop.f32.mrb[38].mxu0  ;;  %v1077_v3 = vadd.f32 %v2536_v35, %v2691_v30 }
 0x13b   : > { %v2168_v36 = vpack.c.bf16 %v2693_v31, %v2689_v29  ;;  %v1080_v60 = vadd.f32 %v2693_v31, %v2536_v35  ;;  %v2701_v1 = vpop.f32.mrb[39].mxu0 }
 0x13c   : > { %v2164_v38 = vpack.c.bf16 %v2701_v1, %v2691_v30  ;;  %v1078_v40 = vadd.f32 %v2536_v35, %v2701_v1 }
 0x13d   : > { %v1862_v41 = vpack.c.bf16 %v1080_v60, %v1079_v32 }
 0x13e   : > { %v1857_v42 = vpack.c.bf16 %v1078_v40, %v1077_v3 }
 0x13f   : > { %1942 = vst [vmem:[%s2557_s25 + $0x98] sm:$0xff] %v1862_v41   ;;  %2145 = vmatpush3.bf16.xpose.msra.mxu1 %v2144_v63 }
 0x140   : > { %1941 = vst [vmem:[%s2557_s25 + $0x90] sm:$0xff] %v1857_v42   ;;  %v2714_v43 = vpop.f32.mrb[40].mxu0  ;;  %2147 = vmatprep.subr.bf16.mxu1 %v2146_v48 }
 0x141   : > { %v2716_v45 = vpop.f32.mrb[41].mxu0  ;;  %v1083_v50 = vadd.f32 %v2714_v43, %v2536_v35 }
 0x142   : > { %v2718_v46 = vpop.f32.mrb[42].mxu0  ;;  %v1081_v63 = vadd.f32 %v2536_v35, %v2716_v45 }
 0x143   : > { %v2176_v52 = vpack.c.bf16 %v2718_v46, %v2714_v43  ;;  %v1084_v59 = vadd.f32 %v2718_v46, %v2536_v35  ;;  %v2726_v61 = vpop.f32.mrb[43].mxu0 }
 0x144   : > { %v2172_v44 = vpack.c.bf16 %v2726_v61, %v2716_v45  ;;  %v1082_v54 = vadd.f32 %v2536_v35, %v2726_v61 }
 0x145   : > { %v1872_v56 = vpack.c.bf16 %v1084_v59, %v1083_v50 }
 0x146   : > { %v1867_v57 = vpack.c.bf16 %v1082_v54, %v1081_v63 }
 0x147   : > { %1944 = vst [vmem:[%s2557_s25 + $0xa8] sm:$0xff] %v1872_v56   ;;  %2149 = vmatpush3.bf16.xpose.msra.mxu1 %v2148_v15 }
 0x148   : > { %1943 = vst [vmem:[%s2557_s25 + $0xa0] sm:$0xff] %v1867_v57   ;;  %v2739_v58 = vpop.f32.mrb[44].mxu0  ;;  %2151 = vmatprep.subr.bf16.mxu1 %v2150_v14 }
 0x149   : > { %v2741_v62 = vpop.f32.mrb[45].mxu0  ;;  %v1087_v2 = vadd.f32 %v2739_v58, %v2536_v35 }
 0x14a   : > { %v2743_v0 = vpop.f32.mrb[46].mxu0  ;;  %v1085_v15 = vadd.f32 %v2536_v35, %v2741_v62 }
 0x14b   : > { %v2184_v4 = vpack.c.bf16 %v2743_v0, %v2739_v58  ;;  %v1088_v8 = vadd.f32 %v2743_v0, %v2536_v35  ;;  %v2751_v13 = vpop.f32.mrb[47].mxu0 }
 0x14c   : > { %v2180_v5 = vpack.c.bf16 %v2751_v13, %v2741_v62  ;;  %v1086_v34 = vadd.f32 %v2536_v35, %v2751_v13 }
 0x14d   : > { %v1882_v37 = vpack.c.bf16 %v1088_v8, %v1087_v2 }
 0x14e   : > { %v1877_v39 = vpack.c.bf16 %v1086_v34, %v1085_v15 }
 0x14f   : > { %1946 = vst [vmem:[%s2557_s25 + $0xb8] sm:$0xff] %v1882_v37   ;;  %2153 = vmatpush3.bf16.xpose.msra.mxu1 %v2152_v11 }
 0x150   : > { %1945 = vst [vmem:[%s2557_s25 + $0xb0] sm:$0xff] %v1877_v39   ;;  %v2108_v6 = vpop.f32.mrb[48].mxu0 }
 0x151   : > { %v794_v10 = vpop.f32.mrb[49].mxu0  ;;  %v1091_v14 = vadd.f32 %v2108_v6, %v2536_v35 }
 0x152   : > { %v2109_v12 = vpop.f32.mrb[50].mxu0  ;;  %v1089_v48 = vadd.f32 %v2536_v35, %v794_v10 }
 0x153   : > { %v2158_v16 = vpack.c.bf16 %v2109_v12, %v2108_v6  ;;  %v1092_v17 = vadd.f32 %v2109_v12, %v2536_v35  ;;  %v797_v18 = vpop.f32.mrb[51].mxu0 }
 0x154   : > { %v2154_v53 = vpack.c.bf16 %v797_v18, %v794_v10  ;;  %v1090_v55 = vadd.f32 %v2536_v35, %v797_v18 }
 0x155   : > { %v1892_v19 = vpack.c.bf16 %v1092_v17, %v1091_v14 }
 0x156   : > { %v1887_v7 = vpack.c.bf16 %v1090_v55, %v1089_v48  ;;  %2021 = vmatmul.mubr.f32.vlgmr.msra.gmra.mrb[0].mxu1 %v2525_v33  ;;  %2155 = vmatprep.subr.bf16.mxu1 %v2154_v53 }
 0x157   : > { %1948 = vst [vmem:[%s2557_s25 + $0xc8] sm:$0xff] %v1892_v19   ;;  %2157 = vmatpush3.bf16.xpose.msra.mxu1 %v2156_v25  ;;  %2054 = vmatprep.mubr.f32.mxu1 %v2525_v33 }
 0x158   : > { %1947 = vst [vmem:[%s2557_s25 + $0xc0] sm:$0xff] %v1887_v7   ;;  %2159 = vmatprep.subr.bf16.mxu1 %v2158_v16  ;;  %v2112_v9 = vpop.f32.mrb[52].mxu0 }
 0x159   : > { %v1095_v11 = vadd.f32 %v2112_v9, %v2536_v35  ;;  %v810_v23 = vpop.f32.mrb[53].mxu0 }
 0x15a   : > { %v1093_v47 = vadd.f32 %v2536_v35, %v810_v23  ;;  %v2113_v51 = vpop.f32.mrb[54].mxu0 }
 0x15b   : > { %v2166_v26 = vpack.c.bf16 %v2113_v51, %v2112_v9  ;;  %v1096_v27 = vadd.f32 %v2113_v51, %v2536_v35  ;;  %v813_v28 = vpop.f32.mrb[55].mxu0 }
 0x15c   : > { %v2162_v32 = vpack.c.bf16 %v813_v28, %v810_v23  ;;  %v1094_v21 = vadd.f32 %v2536_v35, %v813_v28 }
 0x15d   : > { %v1902_v49 = vpack.c.bf16 %v1096_v27, %v1095_v11 }
 0x15e   : > { %v1897_v25 = vpack.c.bf16 %v1094_v21, %v1093_v47 }
 0x15f   : > { %1950 = vst [vmem:[%s2557_s25 + $0xd8] sm:$0xff] %v1902_v49   ;;  %2161 = vmatpush3.bf16.xpose.msra.mxu1 %v2160_v24 }
 0x160   : > { %1949 = vst [vmem:[%s2557_s25 + $0xd0] sm:$0xff] %v1897_v25   ;;  %2163 = vmatprep.subr.bf16.mxu1 %v2162_v32  ;;  %v2116_v60 = vpop.f32.mrb[56].mxu0 }
 0x161   : > { %v1099_v3 = vadd.f32 %v2116_v60, %v2536_v35  ;;  %v826_v40 = vpop.f32.mrb[57].mxu0 }
 0x162   : > { %v1097_v41 = vadd.f32 %v2536_v35, %v826_v40  ;;  %v2117_v42 = vpop.f32.mrb[58].mxu0 }
 0x163   : > { %v2174_v50 = vpack.c.bf16 %v2117_v42, %v2116_v60  ;;  %v1100_v59 = vadd.f32 %v2117_v42, %v2536_v35  ;;  %v829_v63 = vpop.f32.mrb[59].mxu0 }
 0x164   : > { %v2170_v54 = vpack.c.bf16 %v829_v63, %v826_v40  ;;  %v1098_v56 = vadd.f32 %v2536_v35, %v829_v63 }
 0x165   : > { %v1912_v20 = vpack.c.bf16 %v1100_v59, %v1099_v3 }
 0x166   : > { %v1907_v22 = vpack.c.bf16 %v1098_v56, %v1097_v41 }
 0x167   : > { %2165 = vmatpush3.bf16.xpose.msra.mxu1 %v2164_v38  ;;  %1952 = vst [vmem:[%s2557_s25 + $0xe8] sm:$0xff] %v1912_v20  }
 0x168   : > { %2167 = vmatprep.subr.bf16.mxu1 %v2166_v26  ;;  %1951 = vst [vmem:[%s2557_s25 + $0xe0] sm:$0xff] %v1907_v22   ;;  %v2120_v24 = vpop.f32.mrb[60].mxu0 }
 0x169   : > { %v1103_v57 = vadd.f32 %v2120_v24, %v2536_v35  ;;  %v842_v2 = vpop.f32.mrb[61].mxu0 }
 0x16a   : > { %v1101_v8 = vadd.f32 %v2536_v35, %v842_v2  ;;  %v2121_v15 = vpop.f32.mrb[62].mxu0 }
 0x16b   : > { %v2182_v34 = vpack.c.bf16 %v2121_v15, %v2120_v24  ;;  %v1104_v37 = vadd.f32 %v2121_v15, %v2536_v35  ;;  %v845_v39 = vpop.f32.mrb[63].mxu0 }
 0x16c   : > { %v2178_v6 = vpack.c.bf16 %v845_v39, %v842_v2  ;;  %v1102_v30 = vadd.f32 %v2536_v35, %v845_v39 }
 0x16d   : > { %v1922_v1 = vpack.c.bf16 %v1104_v37, %v1103_v57 }
 0x16e   : > { %v1917_v38 = vpack.c.bf16 %v1102_v30, %v1101_v8 }
 0x16f   : > { %2169 = vmatpush3.bf16.xpose.msra.mxu1 %v2168_v36  ;;  %1954 = vst [vmem:[%s2557_s25 + $0xf8] sm:$0xff] %v1922_v1  }
 0x170   : > { %2171 = vmatprep.subr.bf16.mxu1 %v2170_v54  ;;  %1953 = vst [vmem:[%s2557_s25 + $0xf0] sm:$0xff] %v1917_v38  }
 0x177   : > { %2173 = vmatpush3.bf16.xpose.msra.mxu1 %v2172_v44 }
 0x178   : > { %2175 = vmatprep.subr.bf16.mxu1 %v2174_v50 }
 0x17f   : > { %2177 = vmatpush3.bf16.xpose.msra.mxu1 %v2176_v52 }
 0x180   : > { %2179 = vmatprep.subr.bf16.mxu1 %v2178_v6 }
 0x187   : > { %2181 = vmatpush3.bf16.xpose.msra.mxu1 %v2180_v5 }
 0x188   : > { %2183 = vmatprep.subr.bf16.mxu1 %v2182_v34 }
 0x18f   : > { %2185 = vmatpush3.bf16.xpose.msra.mxu1 %v2184_v4 }
 0x196   : > { %2055 = vmatmul.mubr.f32.vlgmr.msra.gmra.mrb[2].mxu1 %v2525_v33 }
 0x197   : > { %2279 = shalt.err (!%p2276_p3)
}
 0x198   : > { %s2280_s14 = scalar_lea.hbm %s2819_s8, 4096  ;;  %s2284_s23 = scalar_lea.hbm %s2900_s4, 8192 }
 0x199   : > { %p2281_p4 = scmp.ne.s32.totalorder %s2819_s8, %s2280_s14  ;;  %p2285_p9 = scmp.lt.u32.totalorder %s2819_s8, %s2900_s4 }
 0x19a   : > { %p2286_p10 = scmp.lt.u32.totalorder %s2284_s23, %s2280_s14  ;;  %p2288_p12 = scmp.lt.u32.totalorder %s2280_s14, %s2819_s8 }
 0x19b   : > { %p2282_p7 = pnand %p2281_p4, %p2435_p5 }
 0x19c   : > { %p2287_p11 = por %p2286_p10, %p2285_p9 }
 0x19d   : > { %p2283_p8 = pneg %p2282_p7 }
 0x19e   : > { %p2289_p13 = por %p2288_p12, %p2287_p11 }
 0x1a0   : > { %p2290_p0 = pnand %p2289_p13, %p2283_p8 }
 0x1a2   : > { %2293 = shalt.err (!%p2290_p0)
}
 0x1a3   : > { %s2363_s30 = smov 64   ;;  %s2364_s6 = smov 4   ;;  %v2365_v31 = vmov 1966171168   ;;  %v1009_v43 = vlaneseq }
 0x1a4   : > { %2186 = dma.vmem_to_hbm [thread:$0]  (%p2435_p5), %s2822_s9, 4096, %s2819_s8, %s1426_s10, %s2363_s30, %s2363_s30, %s2364_s6   ;;  %v1007_v36 = vunpack.c.l.s4 %v2365_v31 }
 0x1a5   : > { %v1010_v46 = vshrl.u32 %v1009_v43, 7  ;;  %s1557_s11 = sshll.u32 %s2529_s15, 2  ;;  %vm1031_vm1 = vcmp.lt.s32.totalorder %v1009_v43, 512  ;;  %s2853_s13 = scalar_lea.hbm %s2901_s5, %s2449_s7 }
 0x1a6   : > { %v1008_v45 = vunpack.c.0.s8 %v1007_v36  ;;  %s229_s12 = scalar_lea.vmem [#allocation4], %s1557_s11  ;;  %s1431_s22 = scalar_lea.sflag [#allocation5], %s2529_s15 }
 0x1a7   : > { %s1461_s8 = sshll.u32 %s229_s12, 4  ;;  %s2366_s16 = smov [#allocation4]   ;;  %s2855_s8 = int_to_ptr.vmem [resolvable:$true] %s1461_s8 }
 0x1a8   : > { %v1011_v52 = vsub.s32 %v1008_v45, %v1010_v46  ;;  %s2294_s14 = scalar_lea.vmem %s2855_s8, 64  ;;  %s2298_s17 = sshll.u32 %s2366_s16, 4  ;;  %s2299_s17 = int_to_ptr.vmem [resolvable:$false] %s2298_s17 }
 0x1a9   : > { %p2295_p1 = scmp.ne.s32.totalorder %s2855_s8, %s2294_s14  ;;  %s2300_s23 = scalar_lea.vmem %s2299_s17, 128 }
 0x1aa   : > { %p2301_p4 = scmp.lt.s32.totalorder %s2855_s8, %s2299_s17  ;;  %p2302_p7 = scmp.lt.s32.totalorder %s2300_s23, %s2294_s14 }
 0x1ab   : > { %p2296_p2 = pnand %p2295_p1, %p2435_p5 }
 0x1ac   : > { %p2303_p8 = por %p2302_p7, %p2301_p4 }
 0x1ad   : > { %p2297_p3 = pneg %p2296_p2 }
 0x1af   : > { %p2304_p9 = pnand %p2303_p8, %p2297_p3 }
 0x229   : > { %v924_v33 = vpop.f32.mrb[0].mxu1 }
 0x22a   : > { %v926_v35 = vpop.f32.mrb[1].mxu1 }
 0x22b   : > { %v1004_v29 = vcombine.low %v924_v33, %v926_v35 }
 0x22d   : > { %v1012_v62 = vrot.slane %v1004_v29, %v1011_v52 }
 0x269   : > { %v995_v61 = vpop.f32.mrb[2].mxu1 }
 0x26a   : > { %v997_v44 = vpop.f32.mrb[3].mxu1 }
 0x26b   : > { %v1005_v58 = vcombine.low %v995_v61, %v997_v44 }
 0x26d   : > { %v1019_v0 = vrot.slane %v1005_v58, %v1011_v52 }
 0x26f   : > { %v1020_v4 = vcombine.low %v1012_v62, %v1019_v0 }
 0x271   : > { %v1027_v13 = vrot.slane %v1020_v4, %v1011_v52 }
 0x273   : > { %1033 = vst.msk [vmem:[%s229_s12] sm:$0xf] %vm1031_vm1, %v1027_v13 }
 0x274   : > { %2307 = shalt.err (!%p2304_p9)
}
 0x275   : > { %s2308_s7 = scalar_lea.hbm %s2853_s13, 64  ;;  %s2312_s26 = scalar_lea.hbm %s2901_s5, 128 }
 0x276   : > { %p2309_p10 = scmp.ne.s32.totalorder %s2853_s13, %s2308_s7  ;;  %p2313_p13 = scmp.lt.u32.totalorder %s2853_s13, %s2901_s5 }
 0x277   : > { %p2314_p0 = scmp.lt.u32.totalorder %s2312_s26, %s2308_s7  ;;  %p2316_p2 = scmp.lt.u32.totalorder %s2308_s7, %s2853_s13 }
 0x278   : > { %p2310_p11 = pnand %p2309_p10, %p2435_p5 }
 0x279   : > { %p2315_p1 = por %p2314_p0, %p2313_p13 }
 0x27a   : > { %p2311_p12 = pneg %p2310_p11 }
 0x27b   : > { %p2317_p3 = por %p2316_p2, %p2315_p1 }
 0x27d   : > { %p2318_p4 = pnand %p2317_p3, %p2311_p12 }
 0x27f   : > { %2321 = shalt.err (!%p2318_p4)
}
 0x280   : > { %2187 = dma.vmem_to_hbm [thread:$0]  (%p2435_p5), %s2855_s8, 64, %s2853_s13, %s1431_s22  }
 0x281 PF: > { %p2197_p7 = scmp.ge.s32.totalorder %s2360_s21, 2  ;;  %s1473_s11 = sand.u32 1, %s2348_s18  }
 0x282   : > { %s1474_s12 = scalar_lea.sflag [#allocation3], %s1473_s11 }
 0x283   : > { %p2191_p8 = pnand %p2197_p7, %p2439_p6 }
 0x285   : > { %2339 = dma.done.wait (!%p2191_p8), %s1474_s12, 4096  }
 0x286   : > { %2341 = vsyncadd (!%p2191_p8), %s1474_s12, 4294963200  ;;  %s1483_s9 = scalar_lea.sflag [#allocation5], %s1473_s11 }
 0x287   : > { %2343 = dma.done.wait (!%p2191_p8), %s1483_s9, 64  }
 0x288   : > { %2345 = vsyncadd (!%p2191_p8), %s1483_s9, 4294967232  ;;  %p19_p5 = scmp.ge.s32.totalorder %s2422_s24, 4   ;;  %s2904_s18 = smov %s2352_s19 }
 0x289   : > { %s2905_s19 = smov %s2356_s20  ;;  %s2906_s20 = smov %s2433_s27 }
 0x28a   : > { %s2907_s21 = smov %s2422_s24  ;;  %21 = sbr.rel (!%p19_p5) target bundleno = 5 (0x5), region = 88 }
 0x291   :  { %1488 = vsyncpa [#allocation3], 1 }
 0x292   :  { %1490 = vsyncpa [#allocation3 + $0x1], 1 }
 0x293   :  { %1491 = vsyncpa [#allocation5], 1 }
 0x294   :  { %1493 = vsyncpa [#allocation5 + $0x1], 1 }

</bundles_post_ra>
